<compile_context>
chip_gen: v7x
topology: tpu7x:2x2x1
jax: 0.10.0
libtpu: 0.0.40
codegen_flags: <defaults>
</compile_context>

<pallas_src>
import functools

import jax
import jax.numpy as jnp
from jax.experimental import pallas as pl
from jax.experimental.pallas import tpu as pltpu

IN_DIM = 5
OUT_DIM = 3
OUT_PAD = 8          # output rows padded to a full sublane group
LAYER_SIZE = 32
EPS = 1e-12          # F.normalize default eps
_CHUNK = 512         # lanes per strip-mined chunk (4 f32 vregs wide)


# ----------------------------------------------------------------------------
# Kernel
# ----------------------------------------------------------------------------
def _mlp_kernel(x_ref, w1_ref, b1_ref, w2_ref, b2_ref, w3_ref, b3_ref,
                w4_ref, b4_ref, o_ref, *, act_dtype):
    # x_ref:  (tile, IN_DIM) f32   — natural pixel-major layout (no wrapper x.T)
    # o_ref:  (OUT_PAD, tile) f32  — feature-major, lane-dense stores
    # w*/b*:  resident full blocks; w2..w4 bf16, w1/b1/b4 f32, b2/b3 act_dtype
    w1 = w1_ref[...]
    b1 = b1_ref[...]
    w2 = w2_ref[...]
    b2 = b2_ref[...]
    w3 = w3_ref[...]
    b3 = b3_ref[...]
    w4 = w4_ref[...]
    b4 = b4_ref[...]

    tile = x_ref.shape[0]
    n_chunks = tile // _CHUNK
    # contract both minor axes: (O, I) x (P, I) -> (O, P)
    dn_t = (((1,), (1,)), ((), ()))

    def dense_tanh(h, w, b, out_dtype):
        z = jnp.dot(w, h.astype(w.dtype), preferred_element_type=out_dtype)
        return jnp.tanh(z + b)

    def body(c, carry):
        p0 = pl.multiple_of(c * _CHUNK, _CHUNK)
        xc = x_ref[pl.ds(p0, _CHUNK), :]                       # (CHUNK, 5) f32

        # Layer 1: the pixel-major -> feature-major relayout happens inside
        # the MXU (rhs-transposed contraction), not as a separate HBM pass.
        z1 = jax.lax.dot_general(w1, xc, dn_t,
                                 preferred_element_type=jnp.float32)
        h = jnp.tanh((z1 + b1).astype(act_dtype))              # (32, CHUNK)
        h = dense_tanh(h, w2, b2, act_dtype)                   # (32, CHUNK)
        h = dense_tanh(h, w3, b3, act_dtype)                   # (32, CHUNK)
        y = dense_tanh(h, w4, b4, jnp.float32)                 # (8, CHUNK) f32

        # F.normalize(y, dim=feature) == y * rsqrt(max(||y||^2, eps^2)).
        # Zero-padded rows (3..7) contribute 0 to the sublane reduce.
        ss = jnp.sum(y * y, axis=0, keepdims=True)             # (1, CHUNK)
        inv = jax.lax.rsqrt(jnp.maximum(ss, EPS * EPS))
        o_ref[:, pl.ds(p0, _CHUNK)] = (y * inv).astype(o_ref.dtype)
        return carry

    jax.lax.fori_loop(0, n_chunks, body, 0)


# ----------------------------------------------------------------------------
# Arch gating & tiling
# ----------------------------------------------------------------------------
def _tpu_generation():
    try:
        kind = jax.devices()[0].device_kind.lower()
    except Exception:
        return 0
    for g in (7, 6, 5, 4):
        if f"v{g}" in kind:
            return g
    return 0


def _arch_config():
    gen = _tpu_generation()
    if gen >= 7:
        # 64 MiB VMEM/TC, 2 TensorCores: modest tiles, conservative VMEM limit.
        return dict(act_dtype=jnp.bfloat16, tile_cap=8192,
                    vmem_limit=32 * 1024 * 1024, min_steps=2)
    if gen == 6:
        return dict(act_dtype=jnp.bfloat16, tile_cap=16384,
                    vmem_limit=64 * 1024 * 1024, min_steps=1)
    if gen in (4, 5):
        # No bf16 EUP/VPU: keep tanh in f32 (MXU inputs remain bf16).
        return dict(act_dtype=jnp.float32, tile_cap=16384,
                    vmem_limit=64 * 1024 * 1024, min_steps=1)
    return dict(act_dtype=jnp.float32, tile_cap=8192,
                vmem_limit=32 * 1024 * 1024, min_steps=1)


def _choose_tile(n, tile_cap, min_steps):
    """Even split into 512-px-chunk tiles: padding waste < one chunk/step."""
    n_ch = -(-n // _CHUNK)
    ch_cap = max(1, tile_cap // _CHUNK)
    steps = max(min_steps, -(-n_ch // ch_cap))
    steps = min(steps, n_ch)
    ch_per_tile = -(-n_ch // steps)
    tile = ch_per_tile * _CHUNK
    steps = -(-n_ch // ch_per_tile)
    return tile, steps, steps * tile


# ----------------------------------------------------------------------------
# Wrapper
# ----------------------------------------------------------------------------
@functools.partial(jax.jit, static_argnames=("tile_n", "feature_major_output"))
def pixel_mlp32_tanh(x, params, *, tile_n=None, feature_major_output=False):
    """x: (N, IN_DIM) f32 pixel rows.

    Returns (N, OUT_DIM) f32 matching PixelMLP32Tanh.forward, or the
    lane-dense feature-major (OUT_DIM, N) result if feature_major_output=True
    (skips the final wrapper-side transpose)."""
    n, d = x.shape
    assert d == IN_DIM

    cfg = _arch_config()
    act_dtype = cfg["act_dtype"]
    tile_cap = tile_n if tile_n is not None else cfg["tile_cap"]
    tile, steps, n_pad = _choose_tile(n, tile_cap, cfg["min_steps"])

    x_pad = x if n_pad == n else jnp.pad(x, ((0, n_pad - n), (0, 0)))

    f32, bf16 = jnp.float32, jnp.bfloat16
    w1 = params["w1"].astype(f32)                               # (32, 5)
    b1 = params["b1"].astype(f32).reshape(LAYER_SIZE, 1)
    w2 = params["w2"].astype(bf16)                              # (32, 32)
    b2 = params["b2"].astype(act_dtype).reshape(LAYER_SIZE, 1)
    w3 = params["w3"].astype(bf16)
    b3 = params["b3"].astype(act_dtype).reshape(LAYER_SIZE, 1)
    # Pad output layer 3 -> 8 rows (zeros) so final stores are full vregs.
    w4 = jnp.zeros((OUT_PAD, LAYER_SIZE), bf16).at[:OUT_DIM].set(
        params["w4"].astype(bf16))
    b4 = jnp.zeros((OUT_PAD, 1), f32).at[:OUT_DIM, 0].set(
        params["b4"].astype(f32).reshape(OUT_DIM))

    full = lambda a: pl.BlockSpec(a.shape, lambda i: (0, 0))
    kernel = functools.partial(_mlp_kernel, act_dtype=act_dtype)

    out_fm = pl.pallas_call(
        kernel,
        out_shape=jax.ShapeDtypeStruct((OUT_PAD, n_pad), f32),
        grid_spec=pltpu.PrefetchScalarGridSpec(
            num_scalar_prefetch=0,
            grid=(steps,),
            in_specs=[
                pl.BlockSpec((tile, IN_DIM), lambda i: (i, 0)),  # natural x tile
                full(w1), full(b1),
                full(w2), full(b2),
                full(w3), full(b3),
                full(w4), full(b4),
            ],
            out_specs=pl.BlockSpec((OUT_PAD, tile), lambda i: (0, i)),
        ),
        compiler_params=pltpu.CompilerParams(
            dimension_semantics=("parallel",),
            vmem_limit_bytes=cfg["vmem_limit"],
        ),
    )(x_pad, w1, b1, w2, b2, w3, b3, w4, b4)

    if feature_major_output:
        return out_fm[:OUT_DIM, :n]
    # TODO(synk): the module-compatible (N, 3) return keeps one small (3, N)
    # wrapper transpose; perf-sensitive callers should take the feature-major
    # result (feature_major_output=True) to avoid the extra HBM pass.
    return out_fm[:OUT_DIM, :n].T


# ----------------------------------------------------------------------------
# Parameters & reference (precision-matched)
# ----------------------------------------------------------------------------
def init_params(key):
    """PyTorch-native nn.Linear shapes: weights (out, in), biases (out,)."""
    ks = jax.random.split(key, 8)

    def linear(kw, kb, fan_in, fan_out):
        bound = 1.0 / jnp.sqrt(jnp.float32(fan_in))
        w = jax.random.uniform(kw, (fan_out, fan_in), jnp.float32, -bound, bound)
        b = jax.random.uniform(kb, (fan_out,), jnp.float32, -bound, bound)
        return w, b

    w1, b1 = linear(ks[0], ks[1], IN_DIM, LAYER_SIZE)
    w2, b2 = linear(ks[2], ks[3], LAYER_SIZE, LAYER_SIZE)
    w3, b3 = linear(ks[4], ks[5], LAYER_SIZE, LAYER_SIZE)
    w4, b4 = linear(ks[6], ks[7], LAYER_SIZE, OUT_DIM)
    return dict(w1=w1, b1=b1, w2=w2, b2=b2, w3=w3, b3=b3, w4=w4, b4=b4)


def reference(x, p, act_dtype):
    """Pure-JAX reference mirroring the kernel's per-arch precision."""
    f32, bf16 = jnp.float32, jnp.bfloat16

    z1 = jnp.dot(x.astype(f32), p["w1"].astype(f32).T,
                 preferred_element_type=f32) + p["b1"].astype(f32)
    h = jnp.tanh(z1.astype(act_dtype))

    def hidden(h, w, b):
        z = jnp.dot(h.astype(bf16), w.astype(bf16).T,
                    preferred_element_type=act_dtype) + b.astype(act_dtype)
        return jnp.tanh(z)

    h = hidden(h, p["w2"], p["b2"])
    h = hidden(h, p["w3"], p["b3"])
    z4 = jnp.dot(h.astype(bf16), p["w4"].astype(bf16).T,
                 preferred_element_type=f32) + p["b4"].astype(f32)
    y = jnp.tanh(z4)
    ss = jnp.sum(y * y, axis=-1, keepdims=True)
    return y * jax.lax.rsqrt(jnp.maximum(ss, EPS * EPS))


if __name__ == "__main__":
    key = jax.random.PRNGKey(0)
    k_param, k_x = jax.random.split(key)

    params = init_params(k_param)

    # batch=2, 16x16 image, 5 per-pixel input features -> 512 pixel rows
    batch, hgt, wid = 2, 16, 16
    n = batch * hgt * wid
    x = jax.random.normal(k_x, (n, IN_DIM), dtype=jnp.float32)

    out = jax.block_until_ready(pixel_mlp32_tanh(x, params))
    assert out.shape == (n, OUT_DIM)

    act_dtype = _arch_config()["act_dtype"]
    ref = reference(x, params, act_dtype)
    tol = 3e-2 if act_dtype == jnp.bfloat16 else 1e-3
    err = float(jnp.max(jnp.abs(out - ref)))
    assert err <= tol, f"mismatch vs JAX reference: max abs err {err} > {tol}"

    print("KERNEL_OK")
</pallas_src>

<mosaic_0001>
module attributes {stable_mosaic.version = 11 : i64} {
  func.func @_mlp_kernel(%arg0: i32, %arg1: memref<512x5xf32, #tpu.memory_space<vmem>>, %arg2: memref<32x5xf32, #tpu.memory_space<vmem>>, %arg3: memref<32x1xf32, #tpu.memory_space<vmem>>, %arg4: memref<32x32xbf16, #tpu.memory_space<vmem>>, %arg5: memref<32x1xf32, #tpu.memory_space<vmem>>, %arg6: memref<32x32xbf16, #tpu.memory_space<vmem>>, %arg7: memref<32x1xf32, #tpu.memory_space<vmem>>, %arg8: memref<8x32xbf16, #tpu.memory_space<vmem>>, %arg9: memref<8x1xf32, #tpu.memory_space<vmem>>, %arg10: memref<8x512xf32, #tpu.memory_space<vmem>>) attributes {dimension_semantics = [#tpu.dimension_semantics<parallel>], iteration_bounds = array<i64: 1>, scalar_prefetch = 0 : i64, scratch_operands = 0 : i64, tpu.core_type = #tpu.core_type<tc>, window_params = [{transform_indices = @transform_0, window_bounds = array<i64: 512, 5>}, {pipeline_mode = #tpu.pipeline_mode<synchronous>, transform_indices = @transform_1, window_bounds = array<i64: 32, 5>}, {pipeline_mode = #tpu.pipeline_mode<synchronous>, transform_indices = @transform_2, window_bounds = array<i64: 32, 1>}, {pipeline_mode = #tpu.pipeline_mode<synchronous>, transform_indices = @transform_3, window_bounds = array<i64: 32, 32>}, {pipeline_mode = #tpu.pipeline_mode<synchronous>, transform_indices = @transform_4, window_bounds = array<i64: 32, 1>}, {pipeline_mode = #tpu.pipeline_mode<synchronous>, transform_indices = @transform_5, window_bounds = array<i64: 32, 32>}, {pipeline_mode = #tpu.pipeline_mode<synchronous>, transform_indices = @transform_6, window_bounds = array<i64: 32, 1>}, {pipeline_mode = #tpu.pipeline_mode<synchronous>, transform_indices = @transform_7, window_bounds = array<i64: 8, 32>}, {pipeline_mode = #tpu.pipeline_mode<synchronous>, transform_indices = @transform_8, window_bounds = array<i64: 8, 1>}, {transform_indices = @transform_9, window_bounds = array<i64: 8, 512>}]} {
    %c0 = arith.constant 0 : index
    %c0_0 = arith.constant 0 : index
    %0 = vector.load %arg2[%c0, %c0_0] : memref<32x5xf32, #tpu.memory_space<vmem>>, vector<32x5xf32>
    %c0_1 = arith.constant 0 : index
    %c0_2 = arith.constant 0 : index
    %1 = vector.load %arg3[%c0_1, %c0_2] : memref<32x1xf32, #tpu.memory_space<vmem>>, vector<32x1xf32>
    %c0_3 = arith.constant 0 : index
    %c0_4 = arith.constant 0 : index
    %2 = vector.load %arg4[%c0_3, %c0_4] : memref<32x32xbf16, #tpu.memory_space<vmem>>, vector<32x32xbf16>
    %c0_5 = arith.constant 0 : index
    %c0_6 = arith.constant 0 : index
    %3 = vector.load %arg5[%c0_5, %c0_6] : memref<32x1xf32, #tpu.memory_space<vmem>>, vector<32x1xf32>
    %c0_7 = arith.constant 0 : index
    %c0_8 = arith.constant 0 : index
    %4 = vector.load %arg6[%c0_7, %c0_8] : memref<32x32xbf16, #tpu.memory_space<vmem>>, vector<32x32xbf16>
    %c0_9 = arith.constant 0 : index
    %c0_10 = arith.constant 0 : index
    %5 = vector.load %arg7[%c0_9, %c0_10] : memref<32x1xf32, #tpu.memory_space<vmem>>, vector<32x1xf32>
    %c0_11 = arith.constant 0 : index
    %c0_12 = arith.constant 0 : index
    %6 = vector.load %arg8[%c0_11, %c0_12] : memref<8x32xbf16, #tpu.memory_space<vmem>>, vector<8x32xbf16>
    %c0_13 = arith.constant 0 : index
    %c0_14 = arith.constant 0 : index
    %7 = vector.load %arg9[%c0_13, %c0_14] : memref<8x1xf32, #tpu.memory_space<vmem>>, vector<8x1xf32>
    %c0_i32 = arith.constant 0 : i32
    %c512_i32 = arith.constant 512 : i32
    %8 = arith.muli %c0_i32, %c512_i32 : i32
    %9 = tpu.assume_multiple %8, 512 : i32
    %10 = arith.index_cast %9 : i32 to index
    %c0_15 = arith.constant 0 : index
    %11 = vector.load %arg1[%10, %c0_15] : memref<512x5xf32, #tpu.memory_space<vmem>>, vector<512x5xf32>
    %cst = arith.constant dense<0.000000e+00> : vector<32x512xf32>
    %12 = tpu.matmul %0, %11, %cst {dimension_numbers = #tpu.dot_dimension_numbers<[1], [1], [0], [0], [0, 0, 1, 0], [], []>} : vector<32x5xf32>, vector<512x5xf32>, vector<32x512xf32> -> vector<32x512xf32>
    %13 = vector.broadcast %1 : vector<32x1xf32> to vector<32x512xf32>
    %14 = arith.addf %12, %13 : vector<32x512xf32>
    %15 = math.tanh %14 : vector<32x512xf32>
    %16 = arith.truncf %15 : vector<32x512xf32> to vector<32x512xbf16>
    %cst_16 = arith.constant dense<0.000000e+00> : vector<32x512xf32>
    %17 = tpu.matmul %2, %16, %cst_16 {dimension_numbers = #tpu.dot_dimension_numbers<[1], [0], [0], [1], [0, 0, 1, 1], [], []>} : vector<32x32xbf16>, vector<32x512xbf16>, vector<32x512xf32> -> vector<32x512xf32>
    %18 = vector.broadcast %3 : vector<32x1xf32> to vector<32x512xf32>
    %19 = arith.addf %17, %18 : vector<32x512xf32>
    %20 = math.tanh %19 : vector<32x512xf32>
    %21 = arith.truncf %20 : vector<32x512xf32> to vector<32x512xbf16>
    %cst_17 = arith.constant dense<0.000000e+00> : vector<32x512xf32>
    %22 = tpu.matmul %4, %21, %cst_17 {dimension_numbers = #tpu.dot_dimension_numbers<[1], [0], [0], [1], [0, 0, 1, 1], [], []>} : vector<32x32xbf16>, vector<32x512xbf16>, vector<32x512xf32> -> vector<32x512xf32>
    %23 = vector.broadcast %5 : vector<32x1xf32> to vector<32x512xf32>
    %24 = arith.addf %22, %23 : vector<32x512xf32>
    %25 = math.tanh %24 : vector<32x512xf32>
    %26 = arith.truncf %25 : vector<32x512xf32> to vector<32x512xbf16>
    %cst_18 = arith.constant dense<0.000000e+00> : vector<8x512xf32>
    %27 = tpu.matmul %6, %26, %cst_18 {dimension_numbers = #tpu.dot_dimension_numbers<[1], [0], [0], [1], [0, 0, 1, 1], [], []>} : vector<8x32xbf16>, vector<32x512xbf16>, vector<8x512xf32> -> vector<8x512xf32>
    %28 = vector.broadcast %7 : vector<8x1xf32> to vector<8x512xf32>
    %29 = arith.addf %27, %28 : vector<8x512xf32>
    %30 = math.tanh %29 : vector<8x512xf32>
    %31 = arith.mulf %30, %30 : vector<8x512xf32>
    %cst_19 = arith.constant dense<0.000000e+00> : vector<512xf32>
    %32 = vector.multi_reduction <add>, %31, %cst_19 [0] : vector<8x512xf32> to vector<512xf32>
    %33 = vector.shape_cast %32 : vector<512xf32> to vector<1x512xf32>
    %cst_20 = arith.constant 1.000000e-24 : f32
    %34 = vector.broadcast %cst_20 : f32 to vector<1x512xf32>
    %35 = arith.maximumf %33, %34 : vector<1x512xf32>
    %36 = math.rsqrt %35 : vector<1x512xf32>
    %37 = vector.broadcast %36 : vector<1x512xf32> to vector<8x512xf32>
    %38 = arith.mulf %30, %37 : vector<8x512xf32>
    %c0_21 = arith.constant 0 : index
    %39 = arith.index_cast %9 : i32 to index
    %40 = vector.load %arg10[%c0_21, %39] : memref<8x512xf32, #tpu.memory_space<vmem>>, vector<8x512xf32>
    tpu.vector_store %arg10[%c0_21, %39], %38 {strides = array<i32>} : memref<8x512xf32, #tpu.memory_space<vmem>>, vector<8x512xf32>,
    %c1_i32 = arith.constant 1 : i32
    return
  }
  func.func @transform_0(%arg0: i32) -> (i32, i32) {
    %c0_i32 = arith.constant 0 : i32
    %c0_i32_0 = arith.constant 0 : i32
    return %arg0, %c0_i32 : i32, i32
  }
  func.func @transform_1(%arg0: i32) -> (i32, i32) {
    %c0_i32 = arith.constant 0 : i32
    %c0_i32_0 = arith.constant 0 : i32
    %c0_i32_1 = arith.constant 0 : i32
    return %c0_i32, %c0_i32_0 : i32, i32
  }
  func.func @transform_2(%arg0: i32) -> (i32, i32) {
    %c0_i32 = arith.constant 0 : i32
    %c0_i32_0 = arith.constant 0 : i32
    %c0_i32_1 = arith.constant 0 : i32
    return %c0_i32, %c0_i32_0 : i32, i32
  }
  func.func @transform_3(%arg0: i32) -> (i32, i32) {
    %c0_i32 = arith.constant 0 : i32
    %c0_i32_0 = arith.constant 0 : i32
    %c0_i32_1 = arith.constant 0 : i32
    return %c0_i32, %c0_i32_0 : i32, i32
  }
  func.func @transform_4(%arg0: i32) -> (i32, i32) {
    %c0_i32 = arith.constant 0 : i32
    %c0_i32_0 = arith.constant 0 : i32
    %c0_i32_1 = arith.constant 0 : i32
    return %c0_i32, %c0_i32_0 : i32, i32
  }
  func.func @transform_5(%arg0: i32) -> (i32, i32) {
    %c0_i32 = arith.constant 0 : i32
    %c0_i32_0 = arith.constant 0 : i32
    %c0_i32_1 = arith.constant 0 : i32
    return %c0_i32, %c0_i32_0 : i32, i32
  }
  func.func @transform_6(%arg0: i32) -> (i32, i32) {
    %c0_i32 = arith.constant 0 : i32
    %c0_i32_0 = arith.constant 0 : i32
    %c0_i32_1 = arith.constant 0 : i32
    return %c0_i32, %c0_i32_0 : i32, i32
  }
  func.func @transform_7(%arg0: i32) -> (i32, i32) {
    %c0_i32 = arith.constant 0 : i32
    %c0_i32_0 = arith.constant 0 : i32
    %c0_i32_1 = arith.constant 0 : i32
    return %c0_i32, %c0_i32_0 : i32, i32
  }
  func.func @transform_8(%arg0: i32) -> (i32, i32) {
    %c0_i32 = arith.constant 0 : i32
    %c0_i32_0 = arith.constant 0 : i32
    %c0_i32_1 = arith.constant 0 : i32
    return %c0_i32, %c0_i32_0 : i32, i32
  }
  func.func @transform_9(%arg0: i32) -> (i32, i32) {
    %c0_i32 = arith.constant 0 : i32
    %c0_i32_0 = arith.constant 0 : i32
    return %c0_i32, %arg0 : i32, i32
  }
}

</mosaic_0001>

<bundles_post_ra>
// kernel: pixel_mlp32_tanh.1
= control target key start
LH: loop header
LB: loop body
LE: loop exit
PB: predicated region body
PF: predicated region fallthrough
CT: control target
= control target key end

     0   :  { %vm143_vm0 = vcmask 39936   ;;  %v1406_v3 = vmov 0   ;;  %vm580_vm2 = vcmask 261120   ;;  %s1841_s0 = inlined_call_operand.vmem [shape: f32[512,5], index: 0, kind: input, shape index: {}]   ;;  %s1842_s1 = inlined_call_operand.vmem [shape: f32[32,5], index: 1, kind: input, shape index: {}]   ;;  %s1843_s2 = inlined_call_operand.vmem [shape: f32[32,1], index: 2, kind: input, shape index: {}]   ;;  %s1844_s4 = inlined_call_operand.vmem [shape: f32[32,1], index: 4, kind: input, shape index: {}]   ;;  %s1845_s6 = inlined_call_operand.vmem [shape: f32[32,1], index: 6, kind: input, shape index: {}]   ;;  %s1846_s8 = inlined_call_operand.vmem [shape: f32[8,1], index: 8, kind: input, shape index: {}]   ;;  %s1847_s3 = inlined_call_operand.vmem [shape: bf16[32,32], index: 3, kind: input, shape index: {}]   ;;  %s1848_s5 = inlined_call_operand.vmem [shape: bf16[32,32], index: 5, kind: input, shape index: {}]   ;;  %s1849_s7 = inlined_call_operand.vmem [shape: bf16[8,32], index: 7, kind: input, shape index: {}]   ;;  %s1850_s9 = inlined_call_operand.vmem [shape: f32[8,512], index: 9, kind: output, shape index: {}]  }
   0x1   :  { %v75_v0 = vld [vmem:[%s1841_s0 + $0x80] sm:$0xff]  ;;  %v76_v1 = vld [vmem:[%s1841_s0 + $0x88] sm:$0xff]  ;;  %vm1465_vm1 = vmpackc.low %vm143_vm0, %vm143_vm0  ;;  %1288 = vset.pattern.permute.xlu0 %v1406_v3  ;;  %1289 = vset.pattern.permute.xlu1 %v1406_v3 }
   0x2   :  { %v1191_v4 = vpack.c.bf16 %v76_v1, %v75_v0  ;;  %v107_v5 = vld [vmem:[%s1841_s0 + $0x180] sm:$0xff]  ;;  %v108_v6 = vld [vmem:[%s1841_s0 + $0x188] sm:$0xff]  ;;  %v77_v14 = vld [vmem:[%s1841_s0 + $0x90] sm:$0xff] }
   0x3   :  { %v59_v7 = vld [vmem:[%s1841_s0] sm:$0xff]  ;;  %v1239_v8 = vpack.c.bf16 %v108_v6, %v107_v5  ;;  %v60_v9 = vld [vmem:[%s1841_s0 + $0x8] sm:$0xff]  ;;  %v78_v15 = vld [vmem:[%s1841_s0 + $0x98] sm:$0xff] }
   0x4   :  { %v91_v10 = vld [vmem:[%s1841_s0 + $0x100] sm:$0xff]  ;;  %v92_v11 = vld [vmem:[%s1841_s0 + $0x108] sm:$0xff]  ;;  %1193 = vmatprep.subr.msk.bf16.mxu0 %vm1465_vm1, %v1191_v4  ;;  %v1194_v12 = vpack.c.bf16 %v60_v9, %v59_v7  ;;  %v109_v16 = vld [vmem:[%s1841_s0 + $0x190] sm:$0xff]  ;;  %v1197_v17 = vpack.c.bf16 %v78_v15, %v77_v14 }
   0x5   :  { %v1242_v13 = vpack.c.bf16 %v92_v11, %v91_v10  ;;  %1241 = vmatprep.subr.msk.bf16.mxu1 %vm1465_vm1, %v1239_v8  ;;  %v110_v18 = vld [vmem:[%s1841_s0 + $0x198] sm:$0xff]  ;;  %v61_v20 = vld [vmem:[%s1841_s0 + $0x10] sm:$0xff]  ;;  %v79_v24 = vld [vmem:[%s1841_s0 + $0xa0] sm:$0xff] }
   0x6   :  { %1196 = vmatpush3.bf16.xpose.msk.msra.mxu0 %vm1465_vm1, %v1194_v12  ;;  %v1245_v19 = vpack.c.bf16 %v110_v18, %v109_v16  ;;  %v62_v21 = vld [vmem:[%s1841_s0 + $0x18] sm:$0xff]  ;;  %v93_v22 = vld [vmem:[%s1841_s0 + $0x110] sm:$0xff]  ;;  %v80_v25 = vld [vmem:[%s1841_s0 + $0xa8] sm:$0xff] }
   0x7   :  { %1244 = vmatpush3.bf16.xpose.msk.msra.mxu1 %vm1465_vm1, %v1242_v13  ;;  %1199 = vmatprep.subr.msk.bf16.mxu0 %vm1465_vm1, %v1197_v17  ;;  %v94_v23 = vld [vmem:[%s1841_s0 + $0x118] sm:$0xff]  ;;  %v111_v26 = vld [vmem:[%s1841_s0 + $0x1a0] sm:$0xff]  ;;  %v112_v27 = vld [vmem:[%s1841_s0 + $0x1a8] sm:$0xff]  ;;  %v1200_v28 = vpack.c.bf16 %v62_v21, %v61_v20  ;;  %v1203_v30 = vpack.c.bf16 %v80_v25, %v79_v24 }
   0x8   :  { %1247 = vmatprep.subr.msk.bf16.mxu1 %vm1465_vm1, %v1245_v19  ;;  %v1248_v29 = vpack.c.bf16 %v94_v23, %v93_v22  ;;  %v1251_v31 = vpack.c.bf16 %v112_v27, %v111_v26  ;;  %v63_v32 = vld [vmem:[%s1841_s0 + $0x20] sm:$0xff]  ;;  %v64_v33 = vld [vmem:[%s1841_s0 + $0x28] sm:$0xff]  ;;  %v81_v36 = vld [vmem:[%s1841_s0 + $0xb0] sm:$0xff] }
   0x9   :  { %v95_v34 = vld [vmem:[%s1841_s0 + $0x120] sm:$0xff]  ;;  %v96_v35 = vld [vmem:[%s1841_s0 + $0x128] sm:$0xff]  ;;  %v82_v37 = vld [vmem:[%s1841_s0 + $0xb8] sm:$0xff]  ;;  %v1206_v40 = vpack.c.bf16 %v64_v33, %v63_v32 }
   0xa   :  { %v113_v38 = vld [vmem:[%s1841_s0 + $0x1b0] sm:$0xff]  ;;  %v114_v39 = vld [vmem:[%s1841_s0 + $0x1b8] sm:$0xff]  ;;  %v1254_v41 = vpack.c.bf16 %v96_v35, %v95_v34  ;;  %v1209_v42 = vpack.c.bf16 %v82_v37, %v81_v36  ;;  %v1585_v47 = vld [vmem:[%s1842_s1] sm:$0xff] }
   0xb   :  { %v1257_v43 = vpack.c.bf16 %v114_v39, %v113_v38  ;;  %v65_v44 = vld [vmem:[%s1841_s0 + $0x30] sm:$0xff]  ;;  %v66_v45 = vld [vmem:[%s1841_s0 + $0x38] sm:$0xff]  ;;  %v83_v49 = vld [vmem:[%s1841_s0 + $0xc0] sm:$0xff]  ;;  %1143 = vmatprep.mubr.msk.f32.mxu0 %vm143_vm0, %v1585_v47  ;;  %1183 = vmatprep.mubr.msk.f32.mxu1 %vm143_vm0, %v1585_v47 }
   0xc   :  { %v97_v46 = vld [vmem:[%s1841_s0 + $0x130] sm:$0xff]  ;;  %v98_v48 = vld [vmem:[%s1841_s0 + $0x138] sm:$0xff]  ;;  %v84_v50 = vld [vmem:[%s1841_s0 + $0xc8] sm:$0xff]  ;;  %v1212_v55 = vpack.c.bf16 %v66_v45, %v65_v44 }
   0xd   :  { %v115_v51 = vld [vmem:[%s1841_s0 + $0x1c0] sm:$0xff]  ;;  %v116_v52 = vld [vmem:[%s1841_s0 + $0x1c8] sm:$0xff]  ;;  %v39_v54 = vld [vmem:[%s1843_s2 + $0x10] sm:$0xff]  ;;  %v1260_v56 = vpack.c.bf16 %v98_v48, %v97_v46  ;;  %v1215_v58 = vpack.c.bf16 %v84_v50, %v83_v49 }
   0xe   :  { %1202 = vmatpush3.bf16.xpose.msk.msra.mxu0 %vm1465_vm1, %v1200_v28  ;;  %v37_v53 = vld [vmem:[%s1843_s2] sm:$0xff]  ;;  %v38_v57 = vld [vmem:[%s1843_s2 + $0x8] sm:$0xff]  ;;  %135 = vperm.xlu1 %1289, %v39_v54   ;;  %v1263_v59 = vpack.c.bf16 %v116_v52, %v115_v51  ;;  %v40_v60 = vld [vmem:[%s1843_s2 + $0x18] sm:$0xff] }
   0xf   :  { %1250 = vmatpush3.bf16.xpose.msk.msra.mxu1 %vm1465_vm1, %v1248_v29  ;;  %1205 = vmatprep.subr.msk.bf16.mxu0 %vm1465_vm1, %v1203_v30  ;;  %v67_v61 = vld [vmem:[%s1841_s0 + $0x40] sm:$0xff]  ;;  %v68_v62 = vld [vmem:[%s1841_s0 + $0x48] sm:$0xff]  ;;  %v85_v4 = vld [vmem:[%s1841_s0 + $0xd0] sm:$0xff] }
  0x10   :  { %1253 = vmatprep.subr.msk.bf16.mxu1 %vm1465_vm1, %v1251_v31  ;;  %125 = vperm.xlu0 %1288, %v37_v53   ;;  %v45_v63 = vld [vmem:[%s1844_s4] sm:$0xff]  ;;  %v100_v1 = vld [vmem:[%s1841_s0 + $0x148] sm:$0xff]  ;;  %v86_v5 = vld [vmem:[%s1841_s0 + $0xd8] sm:$0xff]  ;;  %v1218_v9 = vpack.c.bf16 %v68_v62, %v67_v61 }
  0x11   :  { %v99_v0 = vld [vmem:[%s1841_s0 + $0x140] sm:$0xff]  ;;  %v117_v6 = vld [vmem:[%s1841_s0 + $0x1d0] sm:$0xff]  ;;  %v118_v7 = vld [vmem:[%s1841_s0 + $0x1d8] sm:$0xff]  ;;  %v1221_v12 = vpack.c.bf16 %v86_v5, %v85_v4 }
  0x12   :  { %140 = vperm.xlu1 %1289, %v40_v60   ;;  %v46_v8 = vld [vmem:[%s1844_s4 + $0x8] sm:$0xff]  ;;  %v1266_v10 = vpack.c.bf16 %v100_v1, %v99_v0  ;;  %v47_v11 = vld [vmem:[%s1844_s4 + $0x10] sm:$0xff]  ;;  %v1269_v13 = vpack.c.bf16 %v118_v7, %v117_v6  ;;  %v48_v14 = vld [vmem:[%s1844_s4 + $0x18] sm:$0xff] }
  0x13   :  { %v69_v15 = vld [vmem:[%s1841_s0 + $0x50] sm:$0xff]  ;;  %v70_v16 = vld [vmem:[%s1841_s0 + $0x58] sm:$0xff]  ;;  %v53_v17 = vld [vmem:[%s1845_s6] sm:$0xff] }
  0x14   :  { %130 = vperm.xlu0 %1288, %v38_v57   ;;  %v101_v18 = vld [vmem:[%s1841_s0 + $0x150] sm:$0xff]  ;;  %v102_v19 = vld [vmem:[%s1841_s0 + $0x158] sm:$0xff]  ;;  %v87_v20 = vld [vmem:[%s1841_s0 + $0xe0] sm:$0xff]  ;;  %v1224_v25 = vpack.c.bf16 %v70_v16, %v69_v15 }
  0x15   :  { %v88_v21 = vld [vmem:[%s1841_s0 + $0xe8] sm:$0xff]  ;;  %v119_v22 = vld [vmem:[%s1841_s0 + $0x1e0] sm:$0xff]  ;;  %v1272_v26 = vpack.c.bf16 %v102_v19, %v101_v18  ;;  %v55_v27 = vld [vmem:[%s1845_s6 + $0x10] sm:$0xff] }
  0x16   :  { %1208 = vmatpush3.bf16.xpose.msk.msra.mxu0 %vm1465_vm1, %v1206_v40  ;;  %557 = vperm.xlu1 %1289, %v46_v8   ;;  %v120_v23 = vld [vmem:[%s1841_s0 + $0x1e8] sm:$0xff]  ;;  %v1227_v28 = vpack.c.bf16 %v88_v21, %v87_v20  ;;  %v56_v30 = vld [vmem:[%s1845_s6 + $0x18] sm:$0xff]  ;;  %v71_v31 = vld [vmem:[%s1841_s0 + $0x60] sm:$0xff] }
  0x17   :  { %1256 = vmatpush3.bf16.xpose.msk.msra.mxu1 %vm1465_vm1, %v1254_v41  ;;  %1211 = vmatprep.subr.msk.bf16.mxu0 %vm1465_vm1, %v1209_v42  ;;  %v54_v24 = vld [vmem:[%s1845_s6 + $0x8] sm:$0xff]  ;;  %v1275_v29 = vpack.c.bf16 %v120_v23, %v119_v22  ;;  %v58_v33 = vld [vmem:[%s1846_s8] sm:$0xff]  ;;  %v89_v36 = vld [vmem:[%s1841_s0 + $0xf0] sm:$0xff] }
  0x18   :  { %1259 = vmatprep.subr.msk.bf16.mxu1 %vm1465_vm1, %v1257_v43  ;;  %552 = vperm.xlu0 %1288, %v45_v63   ;;  %v72_v32 = vld [vmem:[%s1841_s0 + $0x68] sm:$0xff]  ;;  %v103_v34 = vld [vmem:[%s1841_s0 + $0x160] sm:$0xff]  ;;  %v90_v37 = vld [vmem:[%s1841_s0 + $0xf8] sm:$0xff] }
  0x19   :  { %v104_v35 = vld [vmem:[%s1841_s0 + $0x168] sm:$0xff]  ;;  %v121_v38 = vld [vmem:[%s1841_s0 + $0x1f0] sm:$0xff]  ;;  %v122_v39 = vld [vmem:[%s1841_s0 + $0x1f8] sm:$0xff]  ;;  %v1230_v40 = vpack.c.bf16 %v72_v32, %v71_v31  ;;  %v1233_v42 = vpack.c.bf16 %v90_v37, %v89_v36 }
  0x1a   :  { %567 = vperm.xlu1 %1289, %v48_v14   ;;  %v1278_v41 = vpack.c.bf16 %v104_v35, %v103_v34  ;;  %v1281_v43 = vpack.c.bf16 %v122_v39, %v121_v38  ;;  %v73_v44 = vld [vmem:[%s1841_s0 + $0x70] sm:$0xff]  ;;  %v74_v45 = vld [vmem:[%s1841_s0 + $0x78] sm:$0xff]  ;;  %v34_v51 = vld [vmem:[%s1842_s1 + $0x8] sm:$0xff] }
  0x1b   :  { %v105_v46 = vld [vmem:[%s1841_s0 + $0x170] sm:$0xff]  ;;  %v106_v48 = vld [vmem:[%s1841_s0 + $0x178] sm:$0xff]  ;;  %v1236_v49 = vpack.c.bf16 %v74_v45, %v73_v44 }
  0x1c   :  { %562 = vperm.xlu0 %1288, %v47_v11   ;;  %v1284_v50 = vpack.c.bf16 %v106_v48, %v105_v46  ;;  %v35_v52 = vld [vmem:[%s1842_s1 + $0x10] sm:$0xff]  ;;  %v36_v2 = vld [vmem:[%s1842_s1 + $0x18] sm:$0xff] }
  0x1e   :  { %1214 = vmatpush3.bf16.xpose.msk.msra.mxu0 %vm1465_vm1, %v1212_v55  ;;  %724 = vperm.xlu1 %1289, %v54_v24  }
  0x1f   :  { %1262 = vmatpush3.bf16.xpose.msk.msra.mxu1 %vm1465_vm1, %v1260_v56  ;;  %1217 = vmatprep.subr.msk.bf16.mxu0 %vm1465_vm1, %v1215_v58 }
  0x20   :  { %1265 = vmatprep.subr.msk.bf16.mxu1 %vm1465_vm1, %v1263_v59  ;;  %719 = vperm.xlu0 %1288, %v53_v17  }
  0x22   :  { %734 = vperm.xlu1 %1289, %v56_v30  }
  0x24   :  { %729 = vperm.xlu0 %1288, %v55_v27  }
  0x26   :  { %1220 = vmatpush3.bf16.xpose.msk.msra.mxu0 %vm1465_vm1, %v1218_v9 }
  0x27   :  { %1268 = vmatpush3.bf16.xpose.msk.msra.mxu1 %vm1465_vm1, %v1266_v10  ;;  %1223 = vmatprep.subr.msk.bf16.mxu0 %vm1465_vm1, %v1221_v12 }
  0x28   :  { %1271 = vmatprep.subr.msk.bf16.mxu1 %vm1465_vm1, %v1269_v13  ;;  %885 = vperm.xlu0 %1288, %v58_v33  }
  0x2e   :  { %1226 = vmatpush3.bf16.xpose.msk.msra.mxu0 %vm1465_vm1, %v1224_v25 }
  0x2f   :  { %1274 = vmatpush3.bf16.xpose.msk.msra.mxu1 %vm1465_vm1, %v1272_v26  ;;  %1229 = vmatprep.subr.msk.bf16.mxu0 %vm1465_vm1, %v1227_v28 }
  0x30   :  { %1277 = vmatprep.subr.msk.bf16.mxu1 %vm1465_vm1, %v1275_v29 }
  0x36   :  { %1232 = vmatpush3.bf16.xpose.msk.msra.mxu0 %vm1465_vm1, %v1230_v40 }
  0x37   :  { %1280 = vmatpush3.bf16.xpose.msk.msra.mxu1 %vm1465_vm1, %v1278_v41  ;;  %1235 = vmatprep.subr.msk.bf16.mxu0 %vm1465_vm1, %v1233_v42 }
  0x38   :  { %1283 = vmatprep.subr.msk.bf16.mxu1 %vm1465_vm1, %v1281_v43 }
  0x3e   :  { %1238 = vmatpush3.bf16.xpose.msk.msra.mxu0 %vm1465_vm1, %v1236_v49 }
  0x3f   :  { %1286 = vmatpush3.bf16.xpose.msk.msra.mxu1 %vm1465_vm1, %v1284_v50 }
  0x45   :  { %1144 = vmatmul.mubr.msk.f32.vlgmr.msra.gmra.mrb[0].mxu0 %vm143_vm0, %v1585_v47 }
  0x46   :  { %1184 = vmatmul.mubr.msk.f32.vlgmr.msra.gmra.mrb[0].mxu1 %vm143_vm0, %v1585_v47  ;;  %1145 = vmatprep.mubr.msk.f32.mxu0 %vm143_vm0, %v34_v51 }
  0x47   :  { %1185 = vmatprep.mubr.msk.f32.mxu1 %vm143_vm0, %v34_v51 }
  0x49   :  { %1146 = vmatmul.mubr.msk.f32.gmra.mrb[2].mxu0 %vm143_vm0, %v34_v51 }
  0x4a   :  { %1186 = vmatmul.mubr.msk.f32.gmra.mrb[2].mxu1 %vm143_vm0, %v34_v51  ;;  %1147 = vmatprep.mubr.msk.f32.mxu0 %vm143_vm0, %v35_v52  ;;  %v1290_v51 = vld [vmem:[%s1847_s3] sm:$0xff]  }
  0x4b   :  { %1187 = vmatprep.mubr.msk.f32.mxu1 %vm143_vm0, %v35_v52 }
  0x4d   :  { %1148 = vmatmul.mubr.msk.f32.gmra.mrb[4].mxu0 %vm143_vm0, %v35_v52 }
  0x4e   :  { %1188 = vmatmul.mubr.msk.f32.gmra.mrb[4].mxu1 %vm143_vm0, %v35_v52  ;;  %1149 = vmatprep.mubr.msk.f32.mxu0 %vm143_vm0, %v36_v2  ;;  %v1291_v52 = vld [vmem:[%s1847_s3 + $0x8] sm:$0xff]  }
  0x4f   :  { %1189 = vmatprep.mubr.msk.f32.mxu1 %vm143_vm0, %v36_v2 }
  0x51   :  { %1150 = vmatmul.mubr.msk.f32.gmra.mrb[6].mxu0 %vm143_vm0, %v36_v2 }
  0x52   :  { %1190 = vmatmul.mubr.msk.f32.gmra.mrb[6].mxu1 %vm143_vm0, %v36_v2  ;;  %619 = vmatprep.mubr.bf16.mxu0 %v1406_v3 }
  0x53   :  { %672 = vmatprep.mubr.bf16.mxu1 %v1406_v3 }
  0x8d   :  { %v136_v62 = vpop.permute.xlu1 %135 }
  0x8f   :  { %v126_v47 = vpop.permute.xlu0 %125 }
  0x91   :  { %v141_v17 = vpop.permute.xlu1 %140 }
  0x93   :  { %v131_v61 = vpop.permute.xlu0 %130 }
  0x97   :  { %v553_v2 = vpop.permute.xlu0 %552 }
 0x118   :  { %v414_v53 = vpop.f32.mrb[0].mxu0 }
 0x119   :  { %v503_v54 = vpop.f32.mrb[0].mxu1  ;;  %v415_v55 = vadd.f32 %v414_v53, %v126_v47  ;;  %v416_v57 = vpop.f32.mrb[1].mxu0 }
 0x11a   :  { %v504_v56 = vadd.f32 %v503_v54, %v126_v47  ;;  %v505_v58 = vpop.f32.mrb[1].mxu1  ;;  %v417_v59 = vadd.f32 %v416_v57, %v126_v47 }
 0x11b   :  { %v506_v60 = vadd.f32 %v505_v58, %v126_v47  ;;  %1294 = vtanh.f32 %v415_v55  ;;  %v558_v47 = vpop.permute.xlu1 %557 }
 0x11c   :  { %1296 = vtanh.f32 %v504_v56  ;;  %v420_v63 = vpop.f32.mrb[2].mxu0 }
 0x11d   :  { %v509_v0 = vpop.f32.mrb[2].mxu1  ;;  %1298 = vtanh.f32 %v417_v59  ;;  %v421_v1 = vadd.f32 %v420_v63, %v131_v61  ;;  %v422_v5 = vpop.f32.mrb[3].mxu0 }
 0x11e   :  { %v510_v4 = vadd.f32 %v509_v0, %v131_v61  ;;  %v511_v6 = vpop.f32.mrb[3].mxu1  ;;  %1300 = vtanh.f32 %v506_v60  ;;  %v423_v7 = vadd.f32 %v422_v5, %v131_v61 }
 0x11f   :  { %v512_v8 = vadd.f32 %v511_v6, %v131_v61  ;;  %1302 = vtanh.f32 %v421_v1 }
 0x120   :  { %1304 = vtanh.f32 %v510_v4  ;;  %v426_v9 = vpop.f32.mrb[4].mxu0 }
 0x121   :  { %v515_v10 = vpop.f32.mrb[4].mxu1  ;;  %1306 = vtanh.f32 %v423_v7  ;;  %v427_v11 = vadd.f32 %v426_v9, %v136_v62  ;;  %v428_v13 = vpop.f32.mrb[5].mxu0 }
 0x122   :  { %v516_v12 = vadd.f32 %v515_v10, %v136_v62  ;;  %v517_v14 = vpop.f32.mrb[5].mxu1  ;;  %1308 = vtanh.f32 %v512_v8  ;;  %v429_v15 = vadd.f32 %v428_v13, %v136_v62  ;;  %v563_v7 = vpop.permute.xlu0 %562 }
 0x123   :  { %v518_v16 = vadd.f32 %v517_v14, %v136_v62  ;;  %1310 = vtanh.f32 %v427_v11  ;;  %v568_v8 = vpop.permute.xlu1 %567 }
 0x124   :  { %1312 = vtanh.f32 %v516_v12  ;;  %v432_v18 = vpop.f32.mrb[6].mxu0 }
 0x125   :  { %v521_v19 = vpop.f32.mrb[6].mxu1  ;;  %v1295_v20 = vpop.eup %1294  ;;  %1314 = vtanh.f32 %v429_v15  ;;  %v433_v21 = vadd.f32 %v432_v18, %v141_v17 }
 0x126   :  { %v522_v22 = vadd.f32 %v521_v19, %v141_v17  ;;  %v434_v23 = vpop.f32.mrb[7].mxu0  ;;  %v523_v24 = vpop.f32.mrb[7].mxu1  ;;  %1316 = vtanh.f32 %v518_v16 }
 0x127   :  { %v1297_v25 = vpop.eup %1296  ;;  %v435_v26 = vadd.f32 %v434_v23, %v141_v17  ;;  %v524_v27 = vadd.f32 %v523_v24, %v141_v17  ;;  %1318 = vtanh.f32 %v433_v21 }
 0x128   :  { %v1299_v28 = vpop.eup %1298  ;;  %1320 = vtanh.f32 %v522_v22 }
 0x129   :  { %v1301_v29 = vpop.eup %1300  ;;  %1322 = vtanh.f32 %v435_v26 }
 0x12a   :  { %v1303_v30 = vpop.eup %1302  ;;  %1324 = vtanh.f32 %v524_v27 }
 0x12b   :  { %v1305_v31 = vpop.eup %1304  ;;  %v542_v32 = vpack.c.bf16 %v1303_v30, %v1295_v20 }
 0x12c   :  { %v1307_v33 = vpop.eup %1306  ;;  %v544_v34 = vpack.c.bf16 %v1305_v31, %v1297_v25 }
 0x12d   :  { %v1309_v35 = vpop.eup %1308  ;;  %v543_v36 = vpack.c.bf16 %v1307_v33, %v1299_v28 }
 0x12e   :  { %v1311_v37 = vpop.eup %1310  ;;  %v545_v38 = vpack.c.bf16 %v1309_v35, %v1301_v29 }
 0x12f   :  { %v1313_v39 = vpop.eup %1312  ;;  %587 = vmatprep.subr.bf16.mxu0 %v543_v36 }
 0x130   :  { %v1315_v40 = vpop.eup %1314  ;;  %640 = vmatprep.subr.bf16.mxu1 %v545_v38  ;;  %588 = vmatpush1.bf16.msra.mxu0 %v542_v32 }
 0x131   :  { %v1317_v41 = vpop.eup %1316  ;;  %641 = vmatpush1.bf16.msra.mxu1 %v544_v34 }
 0x132   :  { %v1319_v42 = vpop.eup %1318 }
 0x133   :  { %v1321_v43 = vpop.eup %1320  ;;  %v546_v44 = vpack.c.bf16 %v1319_v42, %v1311_v37 }
 0x134   :  { %v1323_v45 = vpop.eup %1322  ;;  %v548_v46 = vpack.c.bf16 %v1321_v43, %v1313_v39 }
 0x135   :  { %v1325_v48 = vpop.eup %1324  ;;  %v547_v49 = vpack.c.bf16 %v1323_v45, %v1315_v40 }
 0x136   :  { %v549_v50 = vpack.c.bf16 %v1325_v48, %v1317_v41 }
 0x137   :  { %589 = vmatprep.subr.bf16.mxu0 %v547_v49 }
 0x138   :  { %642 = vmatprep.subr.bf16.mxu1 %v549_v50  ;;  %590 = vmatpush1.bf16.msra.mxu0 %v546_v44  ;;  %v1292_v50 = vld [vmem:[%s1848_s5] sm:$0xff]  }
 0x139   :  { %643 = vmatpush1.bf16.msra.mxu1 %v548_v46 }
 0x13b   :  { %1099 = vmatmul.mubr.msk.bf16.vlgmr.msra.gmra.mrb[8].mxu0 %vm580_vm2, %v1290_v51 }
 0x13c   :  { %1101 = vmatmul.mubr.msk.bf16.vlgmr.msra.gmra.mrb[8].mxu1 %vm580_vm2, %v1290_v51  ;;  %629 = vmatprep.mubr.bf16.mxu0 %v1406_v3  ;;  %v1293_v51 = vld [vmem:[%s1848_s5 + $0x8] sm:$0xff]  }
 0x13d   :  { %682 = vmatprep.mubr.bf16.mxu1 %v1406_v3 }
 0x143   :  { %1100 = vmatmul.mubr.msk.bf16.gmra.mrb[12].mxu0 %vm580_vm2, %v1291_v52 }
 0x144   :  { %1102 = vmatmul.mubr.msk.bf16.gmra.mrb[12].mxu1 %vm580_vm2, %v1291_v52  ;;  %785 = vmatprep.mubr.bf16.mxu0 %v1406_v3  ;;  %v720_v52 = vpop.permute.xlu0 %719 }
 0x145   :  { %838 = vmatprep.mubr.bf16.mxu1 %v1406_v3 }
 0x20e   :  { %v621_v53 = vpop.f32.mrb[8].mxu0 }
 0x20f   :  { %v622_v54 = vadd.f32 %v621_v53, %v553_v2  ;;  %v674_v55 = vpop.f32.mrb[8].mxu1  ;;  %v623_v56 = vpop.f32.mrb[9].mxu0 }
 0x210   :  { %v675_v57 = vadd.f32 %v674_v55, %v553_v2  ;;  %v624_v58 = vadd.f32 %v623_v56, %v553_v2  ;;  %v676_v59 = vpop.f32.mrb[9].mxu1  ;;  %v625_v60 = vpop.f32.mrb[10].mxu0 }
 0x211   :  { %1326 = vtanh.f32 %v622_v54  ;;  %v677_v61 = vadd.f32 %v676_v59, %v553_v2  ;;  %v626_v62 = vadd.f32 %v625_v60, %v558_v47  ;;  %v678_v63 = vpop.f32.mrb[10].mxu1  ;;  %v627_v0 = vpop.f32.mrb[11].mxu0 }
 0x212   :  { %1328 = vtanh.f32 %v675_v57  ;;  %v679_v1 = vadd.f32 %v678_v63, %v558_v47  ;;  %v680_v4 = vpop.f32.mrb[11].mxu1  ;;  %v628_v5 = vadd.f32 %v627_v0, %v558_v47  ;;  %v725_v2 = vpop.permute.xlu1 %724 }
 0x213   :  { %1330 = vtanh.f32 %v624_v58  ;;  %v681_v6 = vadd.f32 %v680_v4, %v558_v47 }
 0x214   :  { %1332 = vtanh.f32 %v677_v61 }
 0x215   :  { %1334 = vtanh.f32 %v626_v62 }
 0x216   :  { %1336 = vtanh.f32 %v679_v1  ;;  %v631_v9 = vpop.f32.mrb[12].mxu0 }
 0x217   :  { %1338 = vtanh.f32 %v628_v5  ;;  %v632_v10 = vadd.f32 %v631_v9, %v563_v7  ;;  %v684_v11 = vpop.f32.mrb[12].mxu1  ;;  %v633_v12 = vpop.f32.mrb[13].mxu0 }
 0x218   :  { %1340 = vtanh.f32 %v681_v6  ;;  %v685_v13 = vadd.f32 %v684_v11, %v563_v7  ;;  %v634_v14 = vadd.f32 %v633_v12, %v563_v7  ;;  %v686_v15 = vpop.f32.mrb[13].mxu1  ;;  %v635_v16 = vpop.f32.mrb[14].mxu0 }
 0x219   :  { %1342 = vtanh.f32 %v632_v10  ;;  %v687_v17 = vadd.f32 %v686_v15, %v563_v7  ;;  %v636_v18 = vadd.f32 %v635_v16, %v568_v8  ;;  %v688_v19 = vpop.f32.mrb[14].mxu1  ;;  %v637_v20 = vpop.f32.mrb[15].mxu0 }
 0x21a   :  { %1344 = vtanh.f32 %v685_v13  ;;  %v689_v21 = vadd.f32 %v688_v19, %v568_v8  ;;  %v690_v22 = vpop.f32.mrb[15].mxu1  ;;  %v638_v24 = vadd.f32 %v637_v20, %v568_v8  ;;  %v730_v5 = vpop.permute.xlu0 %729 }
 0x21b   :  { %v1327_v23 = vpop.eup %1326  ;;  %1346 = vtanh.f32 %v634_v14  ;;  %v691_v26 = vadd.f32 %v690_v22, %v568_v8  ;;  %v735_v6 = vpop.permute.xlu1 %734 }
 0x21c   :  { %v1329_v25 = vpop.eup %1328  ;;  %1348 = vtanh.f32 %v687_v17 }
 0x21d   :  { %v1331_v27 = vpop.eup %1330  ;;  %1350 = vtanh.f32 %v636_v18 }
 0x21e   :  { %v1333_v28 = vpop.eup %1332  ;;  %1352 = vtanh.f32 %v689_v21 }
 0x21f   :  { %v1335_v29 = vpop.eup %1334  ;;  %1354 = vtanh.f32 %v638_v24 }
 0x220   :  { %v1337_v30 = vpop.eup %1336  ;;  %1356 = vtanh.f32 %v691_v26  ;;  %v709_v31 = vpack.c.bf16 %v1335_v29, %v1327_v23 }
 0x221   :  { %v1339_v32 = vpop.eup %1338  ;;  %v711_v33 = vpack.c.bf16 %v1337_v30, %v1329_v25 }
 0x222   :  { %v1341_v34 = vpop.eup %1340  ;;  %v710_v35 = vpack.c.bf16 %v1339_v32, %v1331_v27 }
 0x223   :  { %v1343_v36 = vpop.eup %1342  ;;  %v712_v37 = vpack.c.bf16 %v1341_v34, %v1333_v28 }
 0x224   :  { %v1345_v38 = vpop.eup %1344  ;;  %753 = vmatprep.subr.bf16.mxu0 %v710_v35 }
 0x225   :  { %v1347_v39 = vpop.eup %1346  ;;  %806 = vmatprep.subr.bf16.mxu1 %v712_v37  ;;  %754 = vmatpush1.bf16.msra.mxu0 %v709_v31 }
 0x226   :  { %v1349_v40 = vpop.eup %1348  ;;  %807 = vmatpush1.bf16.msra.mxu1 %v711_v33 }
 0x227   :  { %v1351_v41 = vpop.eup %1350 }
 0x228   :  { %v1353_v42 = vpop.eup %1352  ;;  %v713_v43 = vpack.c.bf16 %v1351_v41, %v1343_v36 }
 0x229   :  { %v1355_v44 = vpop.eup %1354  ;;  %v715_v45 = vpack.c.bf16 %v1353_v42, %v1345_v38 }
 0x22a   :  { %v1357_v46 = vpop.eup %1356  ;;  %v714_v48 = vpack.c.bf16 %v1355_v44, %v1347_v39 }
 0x22b   :  { %v716_v49 = vpack.c.bf16 %v1357_v46, %v1349_v40 }
 0x22c   :  { %755 = vmatprep.subr.bf16.mxu0 %v714_v48  ;;  %v57_v48 = vld [vmem:[%s1849_s7] sm:$0xf] }
 0x22d   :  { %808 = vmatprep.subr.bf16.mxu1 %v716_v49  ;;  %756 = vmatpush1.bf16.msra.mxu0 %v713_v43  ;;  %v886_v49 = vpop.permute.xlu0 %885 }
 0x22e   :  { %809 = vmatpush1.bf16.msra.mxu1 %v715_v45 }
 0x230   :  { %1105 = vmatmul.mubr.msk.bf16.vlgmr.msra.gmra.mrb[16].mxu0 %vm580_vm2, %v1292_v50 }
 0x231   :  { %1107 = vmatmul.mubr.msk.bf16.vlgmr.msra.gmra.mrb[16].mxu1 %vm580_vm2, %v1292_v50  ;;  %795 = vmatprep.mubr.bf16.mxu0 %v1406_v3 }
 0x232   :  { %848 = vmatprep.mubr.bf16.mxu1 %v1406_v3 }
 0x238   :  { %1106 = vmatmul.mubr.msk.bf16.gmra.mrb[20].mxu0 %vm580_vm2, %v1293_v51 }
 0x239   :  { %1108 = vmatmul.mubr.msk.bf16.gmra.mrb[20].mxu1 %vm580_vm2, %v1293_v51  ;;  %923 = vmatprep.mubr.bf16.mxu0 %v1406_v3 }
 0x23a   :  { %964 = vmatprep.mubr.bf16.mxu1 %v1406_v3 }
 0x303   :  { %v787_v47 = vpop.f32.mrb[16].mxu0 }
 0x304   :  { %v788_v53 = vadd.f32 %v787_v47, %v720_v52  ;;  %v840_v54 = vpop.f32.mrb[16].mxu1  ;;  %v789_v55 = vpop.f32.mrb[17].mxu0 }
 0x305   :  { %v841_v56 = vadd.f32 %v840_v54, %v720_v52  ;;  %v790_v57 = vadd.f32 %v789_v55, %v720_v52  ;;  %v842_v58 = vpop.f32.mrb[17].mxu1  ;;  %v791_v59 = vpop.f32.mrb[18].mxu0 }
 0x306   :  { %1358 = vtanh.f32 %v788_v53  ;;  %v843_v60 = vadd.f32 %v842_v58, %v720_v52  ;;  %v792_v61 = vadd.f32 %v791_v59, %v725_v2  ;;  %v844_v62 = vpop.f32.mrb[18].mxu1  ;;  %v793_v63 = vpop.f32.mrb[19].mxu0 }
 0x307   :  { %1360 = vtanh.f32 %v841_v56  ;;  %v845_v0 = vadd.f32 %v844_v62, %v725_v2  ;;  %v846_v1 = vpop.f32.mrb[19].mxu1  ;;  %v794_v3 = vadd.f32 %v793_v63, %v725_v2 }
 0x308   :  { %1362 = vtanh.f32 %v790_v57  ;;  %v847_v4 = vadd.f32 %v846_v1, %v725_v2 }
 0x309   :  { %1364 = vtanh.f32 %v843_v60 }
 0x30a   :  { %1366 = vtanh.f32 %v792_v61 }
 0x30b   :  { %1368 = vtanh.f32 %v845_v0  ;;  %v797_v7 = vpop.f32.mrb[20].mxu0 }
 0x30c   :  { %1370 = vtanh.f32 %v794_v3  ;;  %v798_v8 = vadd.f32 %v797_v7, %v730_v5  ;;  %v850_v9 = vpop.f32.mrb[20].mxu1  ;;  %v799_v10 = vpop.f32.mrb[21].mxu0 }
 0x30d   :  { %1372 = vtanh.f32 %v847_v4  ;;  %v851_v11 = vadd.f32 %v850_v9, %v730_v5  ;;  %v800_v12 = vadd.f32 %v799_v10, %v730_v5  ;;  %v852_v13 = vpop.f32.mrb[21].mxu1  ;;  %v801_v14 = vpop.f32.mrb[22].mxu0 }
 0x30e   :  { %1374 = vtanh.f32 %v798_v8  ;;  %v853_v15 = vadd.f32 %v852_v13, %v730_v5  ;;  %v802_v16 = vadd.f32 %v801_v14, %v735_v6  ;;  %v854_v17 = vpop.f32.mrb[22].mxu1  ;;  %v803_v18 = vpop.f32.mrb[23].mxu0 }
 0x30f   :  { %1376 = vtanh.f32 %v851_v11  ;;  %v855_v19 = vadd.f32 %v854_v17, %v735_v6  ;;  %v856_v20 = vpop.f32.mrb[23].mxu1  ;;  %v804_v22 = vadd.f32 %v803_v18, %v735_v6 }
 0x310   :  { %v1359_v21 = vpop.eup %1358  ;;  %1378 = vtanh.f32 %v800_v12  ;;  %v857_v24 = vadd.f32 %v856_v20, %v735_v6 }
 0x311   :  { %v1361_v23 = vpop.eup %1360  ;;  %1380 = vtanh.f32 %v853_v15 }
 0x312   :  { %v1363_v25 = vpop.eup %1362  ;;  %1382 = vtanh.f32 %v802_v16 }
 0x313   :  { %v1365_v26 = vpop.eup %1364  ;;  %1384 = vtanh.f32 %v855_v19 }
 0x314   :  { %v1367_v27 = vpop.eup %1366  ;;  %1386 = vtanh.f32 %v804_v22 }
 0x315   :  { %v1369_v28 = vpop.eup %1368  ;;  %1388 = vtanh.f32 %v857_v24  ;;  %v875_v29 = vpack.c.bf16 %v1367_v27, %v1359_v21 }
 0x316   :  { %v1371_v30 = vpop.eup %1370  ;;  %v877_v31 = vpack.c.bf16 %v1369_v28, %v1361_v23 }
 0x317   :  { %v1373_v32 = vpop.eup %1372  ;;  %v876_v33 = vpack.c.bf16 %v1371_v30, %v1363_v25 }
 0x318   :  { %v1375_v34 = vpop.eup %1374  ;;  %v878_v35 = vpack.c.bf16 %v1373_v32, %v1365_v26 }
 0x319   :  { %v1377_v36 = vpop.eup %1376  ;;  %891 = vmatprep.subr.bf16.mxu0 %v876_v33 }
 0x31a   :  { %v1379_v37 = vpop.eup %1378  ;;  %932 = vmatprep.subr.bf16.mxu1 %v878_v35  ;;  %892 = vmatpush1.bf16.msra.mxu0 %v875_v29 }
 0x31b   :  { %v1381_v38 = vpop.eup %1380  ;;  %933 = vmatpush1.bf16.msra.mxu1 %v877_v31 }
 0x31c   :  { %v1383_v39 = vpop.eup %1382 }
 0x31d   :  { %v1385_v40 = vpop.eup %1384  ;;  %v879_v41 = vpack.c.bf16 %v1383_v39, %v1375_v34 }
 0x31e   :  { %v1387_v42 = vpop.eup %1386  ;;  %v881_v43 = vpack.c.bf16 %v1385_v40, %v1377_v36 }
 0x31f   :  { %v1389_v44 = vpop.eup %1388  ;;  %v880_v45 = vpack.c.bf16 %v1387_v42, %v1379_v37 }
 0x320   :  { %v882_v46 = vpack.c.bf16 %v1389_v44, %v1381_v38 }
 0x321   :  { %893 = vmatprep.subr.bf16.mxu0 %v880_v45 }
 0x322   :  { %934 = vmatprep.subr.bf16.mxu1 %v882_v46  ;;  %894 = vmatpush1.bf16.msra.mxu0 %v879_v41 }
 0x323   :  { %935 = vmatpush1.bf16.msra.mxu1 %v881_v43 }
 0x325   :  { %1109 = vmatmul.mubr.msk.bf16.vlgmr.msra.gmra.mrb[24].mxu0 %vm580_vm2, %v57_v48 }
 0x326   :  { %1110 = vmatmul.mubr.msk.bf16.vlgmr.msra.gmra.mrb[24].mxu1 %vm580_vm2, %v57_v48 }
 0x3f8   :  { %v925_v50 = vpop.f32.mrb[24].mxu0 }
 0x3f9   :  { %v926_v51 = vadd.f32 %v925_v50, %v886_v49  ;;  %v966_v52 = vpop.f32.mrb[24].mxu1  ;;  %v927_v2 = vpop.f32.mrb[25].mxu0 }
 0x3fa   :  { %v967_v47 = vadd.f32 %v966_v52, %v886_v49  ;;  %v928_v53 = vadd.f32 %v927_v2, %v886_v49  ;;  %v968_v54 = vpop.f32.mrb[25].mxu1  ;;  %v929_v55 = vpop.f32.mrb[26].mxu0 }
 0x3fb   :  { %1390 = vtanh.f32 %v926_v51  ;;  %v969_v56 = vadd.f32 %v968_v54, %v886_v49  ;;  %v970_v57 = vpop.f32.mrb[26].mxu1  ;;  %v930_v58 = vpop.f32.mrb[27].mxu0 }
 0x3fc   :  { %1392 = vtanh.f32 %v967_v47  ;;  %v971_v59 = vpop.f32.mrb[27].mxu1 }
 0x3fd   :  { %1394 = vtanh.f32 %v928_v53 }
 0x3fe   :  { %1396 = vtanh.f32 %v969_v56 }
 0x405   :  { %v1391_v60 = vpop.eup %1390 }
 0x406   :  { %v1393_v61 = vpop.eup %1392  ;;  %v977_v62 = vmul.f32 %v1391_v60, %v1391_v60 }
 0x407   :  { %v1395_v63 = vpop.eup %1394  ;;  %v979_v0 = vmul.f32 %v1393_v61, %v1393_v61 }
 0x408   :  { %v1397_v1 = vpop.eup %1396  ;;  %v981_v3 = vrot.slane %v977_v62, 4  ;;  %v978_v4 = vmul.f32 %v1395_v63, %v1395_v63 }
 0x409   :  { %v993_v5 = vrot.slane %v979_v0, 4  ;;  %v980_v6 = vmul.f32 %v1397_v1, %v1397_v1 }
 0x40a   :  { %v982_v7 = vadd.f32 %v981_v3, %v977_v62  ;;  %v987_v8 = vrot.slane %v978_v4, 4 }
 0x40b   :  { %v994_v9 = vadd.f32 %v993_v5, %v979_v0  ;;  %v999_v10 = vrot.slane %v980_v6, 4 }
 0x40c   :  { %v983_v11 = vrot.slane %v982_v7, 2  ;;  %v988_v12 = vadd.f32 %v987_v8, %v978_v4 }
 0x40d   :  { %v995_v13 = vrot.slane %v994_v9, 2  ;;  %v1000_v14 = vadd.f32 %v999_v10, %v980_v6 }
 0x40e   :  { %v984_v15 = vadd.f32 %v983_v11, %v982_v7  ;;  %v989_v16 = vrot.slane %v988_v12, 2 }
 0x40f   :  { %v996_v17 = vadd.f32 %v995_v13, %v994_v9  ;;  %v1001_v18 = vrot.slane %v1000_v14, 2 }
 0x410   :  { %v985_v19 = vrot.slane %v984_v15, 1  ;;  %v990_v20 = vadd.f32 %v989_v16, %v988_v12 }
 0x411   :  { %v997_v21 = vrot.slane %v996_v17, 1  ;;  %v1002_v22 = vadd.f32 %v1001_v18, %v1000_v14 }
 0x412   :  { %v986_v23 = vadd.f32 %v985_v19, %v984_v15  ;;  %v991_v24 = vrot.slane %v990_v20, 1 }
 0x413   :  { %v998_v25 = vadd.f32 %v997_v21, %v996_v17  ;;  %v1003_v26 = vrot.slane %v1002_v22, 1 }
 0x414   :  { %v1005_v27 = vmax.f32 %v986_v23, 1e-24  ;;  %v992_v28 = vadd.f32 %v991_v24, %v990_v20 }
 0x415   :  { %v1007_v29 = vmax.f32 %v998_v25, 1e-24  ;;  %v1004_v30 = vadd.f32 %v1003_v26, %v1002_v22 }
 0x416   :  { %1398 = vrsqrt.f32 %v1005_v27  ;;  %v1006_v31 = vmax.f32 %v992_v28, 1e-24 }
 0x417   :  { %1400 = vrsqrt.f32 %v1007_v29  ;;  %v1008_v32 = vmax.f32 %v1004_v30, 1e-24 }
 0x418   :  { %1402 = vrsqrt.f32 %v1006_v31 }
 0x419   :  { %1404 = vrsqrt.f32 %v1008_v32 }
 0x420   :  { %v1399_v33 = vpop.eup %1398 }
 0x421   :  { %v1401_v34 = vpop.eup %1400  ;;  %v1013_v35 = vmul.f32 %v1399_v33, %v1391_v60 }
 0x422   :  { %v1403_v36 = vpop.eup %1402  ;;  %v1015_v37 = vmul.f32 %v1401_v34, %v1393_v61 }
 0x423   :  { %v1405_v38 = vpop.eup %1404  ;;  %1017 = vst [vmem:[%s1850_s9] sm:$0xff] %v1013_v35  ;;  %v1014_v39 = vmul.f32 %v1403_v36, %v1395_v63 }
 0x424   :  { %1019 = vst [vmem:[%s1850_s9 + $0x10] sm:$0xff] %v1015_v37  ;;  %v1016_v40 = vmul.f32 %v1405_v38, %v1397_v1 }
 0x425   :  { %1018 = vst [vmem:[%s1850_s9 + $0x8] sm:$0xff] %v1014_v39 }
 0x426   :  { %1020 = vst [vmem:[%s1850_s9 + $0x18] sm:$0xff] %v1016_v40 }

</bundles_post_ra>
